<compile_context>
chip_gen: v5e
topology: v5e:2x2
jax: 0.10.0
libtpu: 0.0.40
codegen_flags: <defaults>
</compile_context>

<pallas_src>
import functools

import jax
import jax.numpy as jnp
from jax import lax
from jax.experimental import pallas as pl
from jax.experimental.pallas import tpu as pltpu


def _leaky_relu(x, negative_slope=0.2):
    return jnp.where(x > 0, x, negative_slope * x)


def lencoder_kernel(x_ref, w1_ref, b1_ref, w2_ref, b2_ref, w3_ref, b3_ref, o_ref):
    # x_ref: [bt, nROI] batch-major f32 (native torch layout -- the feature-major
    # relayout is fused here).  Layer 1 contracts BOTH operands' last dims, so
    # the result [h1, bt] is already lane-dense; layers 2/3 are plain W @ h + b.
    x = x_ref[...]
    h = lax.dot_general(
        w1_ref[...], x, (((1,), (1,)), ((), ())),
        preferred_element_type=jnp.float32) + b1_ref[...]
    h = _leaky_relu(h)
    h = jnp.dot(w2_ref[...], h, preferred_element_type=jnp.float32) + b2_ref[...]
    h = _leaky_relu(h)
    z = jnp.dot(w3_ref[...], h, preferred_element_type=jnp.float32) + b3_ref[...]
    o_ref[...] = z.astype(o_ref.dtype)


def _cdiv(a, b):
    return -(-a // b)


def _round_up(n, m):
    return ((n + m - 1) // m) * m


def _choose_bt(B, b_tile):
    """Batch-tile size.

    Small batches: one full-extent block (exact, no padding, no masked writes).
    Large batches: lane-dense multiple of 128, large enough to amortize the
    per-grid-step overhead, capped at ceil(B/2) so the grid keeps >=2 steps
    (v7x megacore) and at 16384 so double-buffered VMEM stays well under the
    32 MiB limit (the [bt, nROI] f32 block lane-pads to 128 lanes in VMEM).
    """
    b_tile = max(int(b_tile), 128)
    if B <= 1024 and B <= b_tile:
        return B
    return _round_up(min(b_tile, _cdiv(B, 2), 16384), 128)


def make_lencoder_params(key, nPattern, nROI, dtype=jnp.float32):
    """nn.Linear-style init.  Weights in torch layout [out, in]; biases [out, 1]."""
    h1 = nROI // 2
    h2 = nROI // 4
    dims = [(nROI, h1), (h1, h2), (h2, nPattern)]
    params = []
    for fan_in, fan_out in dims:
        key, kw, kb = jax.random.split(key, 3)
        bound = 1.0 / float(fan_in) ** 0.5
        w = jax.random.uniform(kw, (fan_out, fan_in), dtype=dtype,
                               minval=-bound, maxval=bound)
        b = jax.random.uniform(kb, (fan_out, 1), dtype=dtype,
                               minval=-bound, maxval=bound)
        params.append((w, b))
    return params


@functools.partial(jax.jit, static_argnames=("b_tile",))
def lencoder_forward(x, params, *, b_tile=8192):
    """x: [B, nROI] float32 (torch layout).  Returns [B, nPattern] float32.

    # TODO(synk): if the caller can supply x already feature-major ([nROI, B]),
    # the in-kernel relayout (and its XLU work) could be skipped entirely.
    """
    (w1, b1), (w2, b2), (w3, b3) = params
    B, nROI = x.shape
    h1, h2, nPattern = w1.shape[0], w2.shape[0], w3.shape[0]

    bt = _choose_bt(B, b_tile)
    grid = (_cdiv(B, bt),)

    flops = 2 * B * (nROI * h1 + h1 * h2 + h2 * nPattern)
    bytes_accessed = (x.size * 4
                      + (w1.size + w2.size + w3.size
                         + b1.size + b2.size + b3.size) * 4
                      + nPattern * B * 4)

    out_t = pl.pallas_call(
        lencoder_kernel,
        out_shape=jax.ShapeDtypeStruct((nPattern, B), jnp.float32),
        grid=grid,
        in_specs=[
            # x tile (batch-major, native layout): pipelined over the batch.
            pl.BlockSpec((bt, nROI), lambda i: (i, 0)),
            # weights / biases: DMA'd once, VMEM-resident across grid steps.
            pl.BlockSpec((h1, nROI), lambda i: (0, 0)),
            pl.BlockSpec((h1, 1), lambda i: (0, 0)),
            pl.BlockSpec((h2, h1), lambda i: (0, 0)),
            pl.BlockSpec((h2, 1), lambda i: (0, 0)),
            pl.BlockSpec((nPattern, h2), lambda i: (0, 0)),
            pl.BlockSpec((nPattern, 1), lambda i: (0, 0)),
        ],
        out_specs=pl.BlockSpec((nPattern, bt), lambda i: (0, i)),
        compiler_params=pltpu.CompilerParams(
            dimension_semantics=("parallel",),     # shard batch tiles across v7x's 2 TCs
            vmem_limit_bytes=32 * 1024 * 1024,     # explicit for v5e; safe on v7x
        ),
        cost_estimate=pl.CostEstimate(
            flops=flops, transcendentals=0, bytes_accessed=bytes_accessed),
    )(x.astype(jnp.float32), w1, b1, w2, b2, w3, b3)

    # Tiny (nPattern-wide) relayout back to torch [B, nPattern].
    return jnp.transpose(out_t)


def lencoder_ref(x, params):
    """Plain-JAX f32 reference of the original PyTorch forward."""
    (w1, b1), (w2, b2), (w3, b3) = params
    h = x @ w1.T + b1[:, 0]
    h = jnp.where(h > 0, h, 0.2 * h)
    h = h @ w2.T + b2[:, 0]
    h = jnp.where(h > 0, h, 0.2 * h)
    return h @ w3.T + b3[:, 0]


if __name__ == "__main__":
    nROI = 32       # -> hidden dims 16 and 8
    nPattern = 4

    key = jax.random.PRNGKey(0)
    key, kx, kx2 = jax.random.split(key, 3)
    params = make_lencoder_params(key, nPattern, nROI)

    # Small batch: single full-extent block (grid of 1, no padding).
    x = jax.random.normal(kx, (8, nROI), dtype=jnp.float32)
    out = jax.block_until_ready(lencoder_forward(x, params))
    assert out.shape == (8, nPattern)
    ref = lencoder_ref(x, params)
    assert jnp.allclose(out, ref, atol=2e-2, rtol=2e-2), \
        "mismatch vs. f32 reference (single-tile path)"

    # Larger, non-tile-aligned batch: multi-step grid with a ragged last block.
    x2 = jax.random.normal(kx2, (200, nROI), dtype=jnp.float32)
    out2 = jax.block_until_ready(lencoder_forward(x2, params, b_tile=128))
    assert out2.shape == (200, nPattern)
    ref2 = lencoder_ref(x2, params)
    assert jnp.allclose(out2, ref2, atol=2e-2, rtol=2e-2), \
        "mismatch vs. f32 reference (gridded / ragged path)"

    print("KERNEL_OK")
</pallas_src>

<mosaic_0001>
module attributes {stable_mosaic.version = 11 : i64} {
  func.func @lencoder_kernel(%arg0: i32, %arg1: memref<8x32xf32, #tpu.memory_space<vmem>>, %arg2: memref<16x32xf32, #tpu.memory_space<vmem>>, %arg3: memref<16x1xf32, #tpu.memory_space<vmem>>, %arg4: memref<8x16xf32, #tpu.memory_space<vmem>>, %arg5: memref<8x1xf32, #tpu.memory_space<vmem>>, %arg6: memref<4x8xf32, #tpu.memory_space<vmem>>, %arg7: memref<4x1xf32, #tpu.memory_space<vmem>>, %arg8: memref<4x8xf32, #tpu.memory_space<vmem>>) attributes {dimension_semantics = [#tpu.dimension_semantics<parallel>], iteration_bounds = array<i64: 1>, scalar_prefetch = 0 : i64, scratch_operands = 0 : i64, tpu.core_type = #tpu.core_type<tc>, window_params = [{transform_indices = @transform_0, window_bounds = array<i64: 8, 32>}, {pipeline_mode = #tpu.pipeline_mode<synchronous>, transform_indices = @transform_1, window_bounds = array<i64: 16, 32>}, {pipeline_mode = #tpu.pipeline_mode<synchronous>, transform_indices = @transform_2, window_bounds = array<i64: 16, 1>}, {pipeline_mode = #tpu.pipeline_mode<synchronous>, transform_indices = @transform_3, window_bounds = array<i64: 8, 16>}, {pipeline_mode = #tpu.pipeline_mode<synchronous>, transform_indices = @transform_4, window_bounds = array<i64: 8, 1>}, {pipeline_mode = #tpu.pipeline_mode<synchronous>, transform_indices = @transform_5, window_bounds = array<i64: 4, 8>}, {pipeline_mode = #tpu.pipeline_mode<synchronous>, transform_indices = @transform_6, window_bounds = array<i64: 4, 1>}, {transform_indices = @transform_7, window_bounds = array<i64: 4, 8>}]} {
    %c0 = arith.constant 0 : index
    %c0_0 = arith.constant 0 : index
    %0 = vector.load %arg1[%c0, %c0_0] : memref<8x32xf32, #tpu.memory_space<vmem>>, vector<8x32xf32>
    %c0_1 = arith.constant 0 : index
    %c0_2 = arith.constant 0 : index
    %1 = vector.load %arg2[%c0_1, %c0_2] : memref<16x32xf32, #tpu.memory_space<vmem>>, vector<16x32xf32>
    %cst = arith.constant dense<0.000000e+00> : vector<16x8xf32>
    %2 = tpu.matmul %1, %0, %cst {dimension_numbers = #tpu.dot_dimension_numbers<[1], [1], [0], [0], [0, 0, 1, 0], [], []>} : vector<16x32xf32>, vector<8x32xf32>, vector<16x8xf32> -> vector<16x8xf32>
    %c0_3 = arith.constant 0 : index
    %c0_4 = arith.constant 0 : index
    %3 = vector.load %arg3[%c0_3, %c0_4] : memref<16x1xf32, #tpu.memory_space<vmem>>, vector<16x1xf32>
    %4 = vector.broadcast %3 : vector<16x1xf32> to vector<16x8xf32>
    %5 = arith.addf %2, %4 : vector<16x8xf32>
    %cst_5 = arith.constant 0.000000e+00 : f32
    %6 = vector.broadcast %cst_5 : f32 to vector<16x8xf32>
    %7 = arith.cmpf ogt, %5, %6 : vector<16x8xf32>
    %cst_6 = arith.constant 2.000000e-01 : f32
    %8 = vector.broadcast %cst_6 : f32 to vector<16x8xf32>
    %9 = arith.mulf %8, %5 : vector<16x8xf32>
    %10 = arith.select %7, %5, %9 : vector<16x8xi1>, vector<16x8xf32>
    %c0_7 = arith.constant 0 : index
    %c0_8 = arith.constant 0 : index
    %11 = vector.load %arg4[%c0_7, %c0_8] : memref<8x16xf32, #tpu.memory_space<vmem>>, vector<8x16xf32>
    %cst_9 = arith.constant dense<0.000000e+00> : vector<8x8xf32>
    %12 = tpu.matmul %11, %10, %cst_9 {dimension_numbers = #tpu.dot_dimension_numbers<[1], [0], [0], [1], [0, 0, 1, 1], [], []>} : vector<8x16xf32>, vector<16x8xf32>, vector<8x8xf32> -> vector<8x8xf32>
    %c0_10 = arith.constant 0 : index
    %c0_11 = arith.constant 0 : index
    %13 = vector.load %arg5[%c0_10, %c0_11] : memref<8x1xf32, #tpu.memory_space<vmem>>, vector<8x1xf32>
    %14 = vector.broadcast %13 : vector<8x1xf32> to vector<8x8xf32>
    %15 = arith.addf %12, %14 : vector<8x8xf32>
    %cst_12 = arith.constant 0.000000e+00 : f32
    %16 = vector.broadcast %cst_12 : f32 to vector<8x8xf32>
    %17 = arith.cmpf ogt, %15, %16 : vector<8x8xf32>
    %cst_13 = arith.constant 2.000000e-01 : f32
    %18 = vector.broadcast %cst_13 : f32 to vector<8x8xf32>
    %19 = arith.mulf %18, %15 : vector<8x8xf32>
    %20 = arith.select %17, %15, %19 : vector<8x8xi1>, vector<8x8xf32>
    %c0_14 = arith.constant 0 : index
    %c0_15 = arith.constant 0 : index
    %21 = vector.load %arg6[%c0_14, %c0_15] : memref<4x8xf32, #tpu.memory_space<vmem>>, vector<4x8xf32>
    %cst_16 = arith.constant dense<0.000000e+00> : vector<4x8xf32>
    %22 = tpu.matmul %21, %20, %cst_16 {dimension_numbers = #tpu.dot_dimension_numbers<[1], [0], [0], [1], [0, 0, 1, 1], [], []>} : vector<4x8xf32>, vector<8x8xf32>, vector<4x8xf32> -> vector<4x8xf32>
    %c0_17 = arith.constant 0 : index
    %c0_18 = arith.constant 0 : index
    %23 = vector.load %arg7[%c0_17, %c0_18] : memref<4x1xf32, #tpu.memory_space<vmem>>, vector<4x1xf32>
    %24 = vector.broadcast %23 : vector<4x1xf32> to vector<4x8xf32>
    %25 = arith.addf %22, %24 : vector<4x8xf32>
    %c0_19 = arith.constant 0 : index
    %c0_20 = arith.constant 0 : index
    %26 = vector.load %arg8[%c0_19, %c0_20] : memref<4x8xf32, #tpu.memory_space<vmem>>, vector<4x8xf32>
    tpu.vector_store %arg8[%c0_19, %c0_20], %25 {strides = array<i32>} : memref<4x8xf32, #tpu.memory_space<vmem>>, vector<4x8xf32>,
    return
  }
  func.func @transform_0(%arg0: i32) -> (i32, i32) {
    %c0_i32 = arith.constant 0 : i32
    %c0_i32_0 = arith.constant 0 : i32
    return %arg0, %c0_i32 : i32, i32
  }
  func.func @transform_1(%arg0: i32) -> (i32, i32) {
    %c0_i32 = arith.constant 0 : i32
    %c0_i32_0 = arith.constant 0 : i32
    %c0_i32_1 = arith.constant 0 : i32
    return %c0_i32, %c0_i32_0 : i32, i32
  }
  func.func @transform_2(%arg0: i32) -> (i32, i32) {
    %c0_i32 = arith.constant 0 : i32
    %c0_i32_0 = arith.constant 0 : i32
    %c0_i32_1 = arith.constant 0 : i32
    return %c0_i32, %c0_i32_0 : i32, i32
  }
  func.func @transform_3(%arg0: i32) -> (i32, i32) {
    %c0_i32 = arith.constant 0 : i32
    %c0_i32_0 = arith.constant 0 : i32
    %c0_i32_1 = arith.constant 0 : i32
    return %c0_i32, %c0_i32_0 : i32, i32
  }
  func.func @transform_4(%arg0: i32) -> (i32, i32) {
    %c0_i32 = arith.constant 0 : i32
    %c0_i32_0 = arith.constant 0 : i32
    %c0_i32_1 = arith.constant 0 : i32
    return %c0_i32, %c0_i32_0 : i32, i32
  }
  func.func @transform_5(%arg0: i32) -> (i32, i32) {
    %c0_i32 = arith.constant 0 : i32
    %c0_i32_0 = arith.constant 0 : i32
    %c0_i32_1 = arith.constant 0 : i32
    return %c0_i32, %c0_i32_0 : i32, i32
  }
  func.func @transform_6(%arg0: i32) -> (i32, i32) {
    %c0_i32 = arith.constant 0 : i32
    %c0_i32_0 = arith.constant 0 : i32
    %c0_i32_1 = arith.constant 0 : i32
    return %c0_i32, %c0_i32_0 : i32, i32
  }
  func.func @transform_7(%arg0: i32) -> (i32, i32) {
    %c0_i32 = arith.constant 0 : i32
    %c0_i32_0 = arith.constant 0 : i32
    return %c0_i32, %arg0 : i32, i32
  }
}

</mosaic_0001>

<bundles_post_ra>
// kernel: lencoder_forward.1
= control target key start
LH: loop header
LB: loop body
LE: loop exit
PB: predicated region body
PF: predicated region fallthrough
CT: control target
= control target key end

     0   :  { %12 = vsyncpa [#allocation3], 0  ;;  %s315_s0 = inlined_call_operand.vmem [shape: f32[8,32], index: 0, kind: input, shape index: {}]   ;;  %s316_s1 = inlined_call_operand.vmem [shape: f32[16,32], index: 1, kind: input, shape index: {}]   ;;  %s317_s2 = inlined_call_operand.vmem [shape: f32[16,1], index: 2, kind: input, shape index: {}]   ;;  %s318_s3 = inlined_call_operand.vmem [shape: f32[8,16], index: 3, kind: input, shape index: {}]   ;;  %s319_s4 = inlined_call_operand.vmem [shape: f32[8,1], index: 4, kind: input, shape index: {}]   ;;  %s320_s5 = inlined_call_operand.hbm [shape: f32[4,8], index: 5, kind: input, shape index: {}]   ;;  %s321_s6 = inlined_call_operand.vmem [shape: f32[4,1], index: 6, kind: input, shape index: {}]   ;;  %s322_s7 = inlined_call_operand.hbm [shape: f32[4,8], index: 7, kind: output, shape index: {}]  }
   0x1   :  { %13 = vsyncpa [#allocation4], 0  ;;  %s29_s26 = sshll.u32 %s320_s5, 4  ;;  %s242_s27 = smov [#allocation2]   ;;  %s30_s26 = int_to_ptr.hbm [resolvable:$true] %s29_s26 }
   0x2   :  { %s31_s28 = sshll.u32 %s242_s27, 4  ;;  %s32_s28 = int_to_ptr.vmem [resolvable:$true] %s31_s28 }
   0x3   :  { %34 = dma.hbm_to_vmem [thread:$0]  %s30_s26, 64, %s32_s28, [#allocation3]  }
   0x4   :  { %238 = dma.done.wait [#allocation3], 64  }
   0x5   :  { %239 = vsyncadd [#allocation3], 4294967232  ;;  %v243_v0 = vmov 0   ;;  %vm56_vm0 = vcmask 261120   ;;  %v41_v1 = vld [vmem:[%s315_s0] sm:$0xff]  ;;  %v43_v3 = vld [vmem:[%s316_s1 + $0x8] sm:$0xff] }
   0x6   :  { %188 = vset.pattern.permute.xlu0 %v243_v0  ;;  %189 = vset.pattern.permute.xlu1 %v243_v0  ;;  %v42_v2 = vld [vmem:[%s316_s1] sm:$0xff]  ;;  %v45_v4 = vld [vmem:[%s317_s2 + $0x8] sm:$0xff]  ;;  %vm102_vm3 = vcmask 130048   ;;  %vm136_vm5 = vcmask 64512   ;;  %vm160_vm6 = vcmask 60416  }
   0x7   :  { %179 = vmatpush.xpose.msk.msra.mxu0 %vm56_vm0, %v41_v1  ;;  %184 = vmatpush.xpose.msk.msra.mxu3 %vm56_vm0, %v41_v1  ;;  %v44_v5 = vld [vmem:[%s317_s2] sm:$0xff] }
   0x8   :  { %53 = vperm.xlu0 %188, %v45_v4   ;;  %v96_v6 = vld [vmem:[%s319_s4] sm:$0xff]  ;;  %s244_s4 = smov [#allocation5]  }
   0x9   :  { %99 = vperm.xlu1 %189, %v96_v6   ;;  %v130_v7 = vld [vmem:[%s321_s6] sm:$0xf]  ;;  %s167_s6 = sshll.u32 %s244_s4, 4  ;;  %s168_s6 = int_to_ptr.vmem [resolvable:$true] %s167_s6 }
   0xa   :  { %180 = vmatmul.msk.f32.vlgmr.msra.gmra.mxu0 %vm56_vm0, %v42_v2  ;;  %181 = vmatmul.msk.f32.vlgmr.msra.gmra.mxu3 %vm56_vm0, %v43_v3  ;;  %v95_v17 = vld [vmem:[%s318_s3] sm:$0xff]  ;;  %s169_s3 = sshll.u32 %s322_s7, 4  ;;  %s170_s3 = int_to_ptr.hbm [resolvable:$true] %s169_s3 }
   0xb   :  { %v129_v23 = vld [vmem:[#allocation2] sm:$0xf] }
  0x10   :  { %48 = vperm.xlu0 %188, %v44_v5  }
  0x11   :  { %133 = vperm.xlu1 %189, %v130_v7  }
  0x7a   :  { %v54_v8 = vpop.permute.xlu0 %53 }
  0x7b   :  { %v100_v19 = vpop.permute.xlu1 %99 }
  0x82   :  { %v49_v9 = vpop.permute.xlu0 %48 }
  0x83   :  { %v134_v25 = vpop.permute.xlu1 %133 }
  0x87   :  { %v83_v10 = vpop.f32.mrf.mxu0 }
  0x88   :  { %v84_v11 = vadd.f32 %v83_v10, %v49_v9 }
  0x8a   :  { %v91_v15 = vmul.f32 0.2, %v84_v11  ;;  %vm89_vm2 = vcmp.gt.f32.partialorder %v84_v11, 0.0 }
  0x8c   :  { %v93_v18 = vsel %vm89_vm2, %v84_v11, %v91_v15 }
  0x8d   :  { %v86_v12 = vpop.f32.mrf.mxu3 }
  0x8e   :  { %v87_v13 = vadd.f32 %v86_v12, %v54_v8 }
  0x90   :  { %vm90_vm1 = vcmp.gt.f32.partialorder %v87_v13, 0.0  ;;  %v92_v14 = vmul.f32 0.2, %v87_v13 }
  0x92   :  { %v94_v16 = vsel %vm90_vm1, %v87_v13, %v92_v14 }
  0x93   :  { %120 = vmatpush.msra.mxu1 %v94_v16 }
  0x95   :  { %121 = vmatpush.msra.mxu1 %v93_v18 }
  0x96   :  { %182 = vmatmul.msk.f32.vlgmr.msra.gmra.mxu1 %vm102_vm3, %v95_v17 }
 0x113   :  { %v123_v20 = vpop.f32.mrf.mxu1 }
 0x114   :  { %v124_v21 = vadd.f32 %v123_v20, %v100_v19 }
 0x116   :  { %vm126_vm4 = vcmp.gt.f32.partialorder %v124_v21, 0.0  ;;  %v127_v22 = vmul.f32 0.2, %v124_v21 }
 0x118   :  { %v128_v24 = vsel %vm126_vm4, %v124_v21, %v127_v22 }
 0x119   :  { %155 = vmatpush.msra.mxu2 %v128_v24 }
 0x11a   :  { %183 = vmatmul.msk.f32.vlgmr.msra.gmra.mxu2 %vm136_vm5, %v129_v23 }
 0x19d   :  { %v157_v26 = vpop.f32.mrf.mxu2 }
 0x19e   :  { %v158_v27 = vadd.f32 %v157_v26, %v134_v25 }
 0x1a0   :  { %161 = vst.msk [vmem:[#allocation5] sm:$0xf] %vm160_vm6, %v158_v27 }
 0x1a1   :  { %172 = dma.vmem_to_hbm [thread:$0]  %s168_s6, 64, %s170_s3, [#allocation4]  }
 0x1a2   :  { %240 = dma.done.wait [#allocation4], 64  }
 0x1a3   :  { %241 = vsyncadd [#allocation4], 4294967232 }
 0x1a4   :  { %177 = vsyncpa [#allocation3], 1 }
 0x1a5   :  { %178 = vsyncpa [#allocation4], 1 }

</bundles_post_ra>
